<compile_context>
chip_gen: v6e
topology: v6e:2x2x1
jax: 0.10.0
libtpu: 0.0.40
codegen_flags: <defaults>
</compile_context>

<pallas_src>
import jax
import jax.numpy as jnp
from jax import lax
from jax.experimental import pallas as pl
from jax.experimental.pallas import tpu as pltpu


def _gemm_add_sigmoid_kernel(w_ref, x_ref, x2_ref, o_ref):
    # (4*Cout, 9*Cin) @ (9*Cin, tm) on the MXU; residual add + tanh-sigmoid epilogue.
    # Store is lane-dense (tm multiple of 128) and sublane-dense (80 rows).
    z = jnp.dot(w_ref[...], x_ref[...], preferred_element_type=jnp.float32)
    z = z + x2_ref[...].astype(jnp.float32)
    o_ref[...] = (0.5 * jnp.tanh(0.5 * z) + 0.5).astype(o_ref.dtype)


# output-row parity ph -> ((row shift dh into the 1-padded input, kernel tap kh), ...)
_PHASE_TAPS = {0: ((0, 3), (1, 1)), 1: ((1, 2), (2, 0))}


def pack_weights(weight):
    """(Cin, Cout, 4, 4) ConvTranspose2d weight -> (4*Cout, 9*Cin) phase GEMM matrix.

    Row p*Cout+co (p = 2*ph + pw) applied to the 9-shift im2col of the 1-padded input
    reproduces y[co, 2a+ph, 2b+pw] of ConvTranspose2d(stride=2, padding=1, k=4).
    """
    Cin, Cout, K, Kw = weight.shape
    assert K == 4 and Kw == 4, "phase packing specialised to kernel_size=4, stride=2"
    w9 = jnp.zeros((4, Cout, 9, Cin), weight.dtype)
    for ph in (0, 1):
        for pw in (0, 1):
            p = 2 * ph + pw
            for dh, kh in _PHASE_TAPS[ph]:
                for dw, kw in _PHASE_TAPS[pw]:
                    w9 = w9.at[p, :, dh * 3 + dw, :].set(weight[:, :, kh, kw].T)
    return w9.reshape(4 * Cout, 9 * Cin)


@jax.jit
def conv_transpose_add_sigmoid(x1, x2, w_pack):
    """sigmoid(x2 + conv_transpose2d(x1, W, stride=2, padding=1)); w_pack = pack_weights(W)."""
    N, Cin, Hi, Wi = x1.shape
    assert N == 1
    P_Cout, KKC = w_pack.shape
    Cout = P_Cout // 4
    assert KKC == 9 * Cin
    Ho, Wo = 2 * Hi, 2 * Wi
    assert x2.shape == (N, Cout, Ho, Wo)

    M = Hi * Wi

    # ---- glue (fused by XLA under this jit; ~7x smaller than a full Ho*Wo im2col) ----
    # 9 shifted views of the 1-padded (undilated) input -> (9*Cin, Hi*Wi)
    xp = jnp.pad(x1[0], ((0, 0), (1, 1), (1, 1)))
    shifts = [xp[:, dh:dh + Hi, dw:dw + Wi] for dh in range(3) for dw in range(3)]
    x_col = jnp.stack(shifts, axis=0).reshape(9 * Cin, M)

    # x2 regrouped by output parity: row p*Cout+co, column a*Wi+b  <->  x2[co, 2a+ph, 2b+pw]
    x2p = (x2[0].reshape(Cout, Hi, 2, Wi, 2)
               .transpose(2, 4, 0, 1, 3)
               .reshape(4 * Cout, M))

    # ---- lane padding / (normally single-step) tiling ----
    Mp = pl.cdiv(M, 128) * 128
    if Mp <= 4096:
        tm = Mp                      # one tile, grid=(1,) — review: no reason to tile here
    else:
        tm = 2048
        Mp = pl.cdiv(Mp, tm) * tm
    if Mp != M:
        x_col = jnp.pad(x_col, ((0, 0), (0, Mp - M)))
        x2p = jnp.pad(x2p, ((0, 0), (0, Mp - M)))
    grid_m = Mp // tm

    cost = pl.CostEstimate(
        flops=2 * P_Cout * KKC * Mp,
        transcendentals=P_Cout * Mp,
        bytes_accessed=4 * (P_Cout * KKC + KKC * Mp + 2 * P_Cout * Mp),
    )

    out_p = pl.pallas_call(
        _gemm_add_sigmoid_kernel,
        out_shape=jax.ShapeDtypeStruct((P_Cout, Mp), x2.dtype),
        grid_spec=pltpu.PrefetchScalarGridSpec(
            num_scalar_prefetch=0,
            grid=(grid_m,),
            in_specs=[
                pl.BlockSpec((P_Cout, KKC), lambda i: (0, 0)),  # packed weights: VMEM-resident
                pl.BlockSpec((KKC, tm), lambda i: (0, i)),      # 9-shift im2col activations
                pl.BlockSpec((P_Cout, tm), lambda i: (0, i)),   # residual x2 (phase layout)
            ],
            out_specs=pl.BlockSpec((P_Cout, tm), lambda i: (0, i)),
        ),
        compiler_params=pltpu.CompilerParams(
            dimension_semantics=("arbitrary",),       # review: no 2-TC split for sub-us work
            allow_input_fusion=[False, True, True],   # let XLA fuse the glue into input path
        ),
        cost_estimate=cost,
    )(w_pack, x_col, x2p)

    # parity de-interleave: (p*Cout+co, a*Wi+b) -> (co, 2a+ph, 2b+pw); cheap reshape/transpose.
    out = (out_p[:, :M].reshape(2, 2, Cout, Hi, Wi)
                      .transpose(2, 3, 0, 4, 1)
                      .reshape(N, Cout, Ho, Wo))
    return out


class Model:
    """JAX/Pallas port of the PyTorch Model (ConvTranspose2d(20,20,4,2,1) + add + sigmoid)."""

    def __init__(self, key, cin=20, cout=20, k=4):
        bound = 1.0 / (cin * k * k) ** 0.5           # PyTorch-style uniform init
        self.weight = jax.random.uniform(key, (cin, cout, k, k), jnp.float32, -bound, bound)
        self.w_pack = pack_weights(self.weight)      # phase packing done once, off the hot path

    def __call__(self, x1, x2, x3):
        # x3 is accepted but unused, matching the reference forward().
        return conv_transpose_add_sigmoid(x1, x2, self.w_pack)


if __name__ == "__main__":
    key = jax.random.PRNGKey(0)
    kw_, k1, k2, k3 = jax.random.split(key, 4)

    Hi = Wi = 16  # small spatial; channels fixed at 20 by the module's conv
    x1 = jax.random.normal(k1, (1, 20, Hi, Wi), jnp.float32)
    x2 = jax.random.normal(k2, (1, 20, 2 * Hi, 2 * Wi), jnp.float32)
    x3 = jax.random.normal(k3, (1, 20, Hi, Wi), jnp.float32)

    model = Model(kw_)
    out = jax.block_until_ready(model(x1, x2, x3))

    # reference: lax dilated conv (== torch ConvTranspose2d) + add + sigmoid
    w_conv = jnp.transpose(model.weight, (1, 0, 2, 3))[:, :, ::-1, ::-1]
    ref_conv = lax.conv_general_dilated(
        x1, w_conv, window_strides=(1, 1), padding=[(2, 2), (2, 2)],
        lhs_dilation=(2, 2), dimension_numbers=("NCHW", "OIHW", "NCHW"))
    ref = jax.nn.sigmoid(x2 + ref_conv)

    assert out.shape == (1, 20, 2 * Hi, 2 * Wi)
    err = float(jnp.max(jnp.abs(out - ref)))
    assert jnp.allclose(out, ref, atol=1e-5, rtol=1e-5), err
    print("KERNEL_OK")
</pallas_src>

<mosaic_0001>
module attributes {stable_mosaic.version = 11 : i64} {
  func.func @_gemm_add_sigmoid_kernel(%arg0: i32, %arg1: memref<80x180xf32, #tpu.memory_space<vmem>>, %arg2: memref<180x256xf32, #tpu.memory_space<vmem>>, %arg3: memref<80x256xf32, #tpu.memory_space<vmem>>, %arg4: memref<80x256xf32, #tpu.memory_space<vmem>>) attributes {dimension_semantics = [#tpu.dimension_semantics<arbitrary>], iteration_bounds = array<i64: 1>, scalar_prefetch = 0 : i64, scratch_operands = 0 : i64, tpu.core_type = #tpu.core_type<tc>, window_params = [{pipeline_mode = #tpu.pipeline_mode<synchronous>, transform_indices = @transform_0, window_bounds = array<i64: 80, 180>}, {transform_indices = @transform_1, window_bounds = array<i64: 180, 256>}, {transform_indices = @transform_2, window_bounds = array<i64: 80, 256>}, {transform_indices = @transform_3, window_bounds = array<i64: 80, 256>}]} {
    %c0 = arith.constant 0 : index
    %c0_0 = arith.constant 0 : index
    %0 = vector.load %arg1[%c0, %c0_0] : memref<80x180xf32, #tpu.memory_space<vmem>>, vector<80x180xf32>
    %c0_1 = arith.constant 0 : index
    %c0_2 = arith.constant 0 : index
    %1 = vector.load %arg2[%c0_1, %c0_2] : memref<180x256xf32, #tpu.memory_space<vmem>>, vector<180x256xf32>
    %cst = arith.constant dense<0.000000e+00> : vector<80x256xf32>
    %2 = tpu.matmul %0, %1, %cst {dimension_numbers = #tpu.dot_dimension_numbers<[1], [0], [0], [1], [0, 0, 1, 1], [], []>} : vector<80x180xf32>, vector<180x256xf32>, vector<80x256xf32> -> vector<80x256xf32>
    %c0_3 = arith.constant 0 : index
    %c0_4 = arith.constant 0 : index
    %3 = vector.load %arg3[%c0_3, %c0_4] : memref<80x256xf32, #tpu.memory_space<vmem>>, vector<80x256xf32>
    %4 = arith.addf %2, %3 : vector<80x256xf32>
    %cst_5 = arith.constant 5.000000e-01 : f32
    %5 = vector.broadcast %cst_5 : f32 to vector<80x256xf32>
    %6 = arith.mulf %5, %4 : vector<80x256xf32>
    %7 = math.tanh %6 : vector<80x256xf32>
    %cst_6 = arith.constant 5.000000e-01 : f32
    %8 = vector.broadcast %cst_6 : f32 to vector<80x256xf32>
    %9 = arith.mulf %8, %7 : vector<80x256xf32>
    %cst_7 = arith.constant 5.000000e-01 : f32
    %10 = vector.broadcast %cst_7 : f32 to vector<80x256xf32>
    %11 = arith.addf %9, %10 : vector<80x256xf32>
    %c0_8 = arith.constant 0 : index
    %c0_9 = arith.constant 0 : index
    %12 = vector.load %arg4[%c0_8, %c0_9] : memref<80x256xf32, #tpu.memory_space<vmem>>, vector<80x256xf32>
    tpu.vector_store %arg4[%c0_8, %c0_9], %11 {strides = array<i32>} : memref<80x256xf32, #tpu.memory_space<vmem>>, vector<80x256xf32>,
    return
  }
  func.func @transform_0(%arg0: i32) -> (i32, i32) {
    %c0_i32 = arith.constant 0 : i32
    %c0_i32_0 = arith.constant 0 : i32
    %c0_i32_1 = arith.constant 0 : i32
    return %c0_i32, %c0_i32_0 : i32, i32
  }
  func.func @transform_1(%arg0: i32) -> (i32, i32) {
    %c0_i32 = arith.constant 0 : i32
    %c0_i32_0 = arith.constant 0 : i32
    return %c0_i32, %arg0 : i32, i32
  }
  func.func @transform_2(%arg0: i32) -> (i32, i32) {
    %c0_i32 = arith.constant 0 : i32
    %c0_i32_0 = arith.constant 0 : i32
    return %c0_i32, %arg0 : i32, i32
  }
  func.func @transform_3(%arg0: i32) -> (i32, i32) {
    %c0_i32 = arith.constant 0 : i32
    %c0_i32_0 = arith.constant 0 : i32
    return %c0_i32, %arg0 : i32, i32
  }
}

</mosaic_0001>

<bundles_post_ra>
// kernel: conv_transpose_add_sigmoid.1
= control target key start
LH: loop header
LB: loop body
LE: loop exit
PB: predicated region body
PF: predicated region fallthrough
CT: control target
= control target key end

     0   :  { %vm131_vm0 = vcmask 1043456   ;;  %vm100_vm1 = vcmask 424960   ;;  %s813_s1 = inlined_call_operand.vmem [shape: f32[180,256], index: 1, kind: input, shape index: {}]   ;;  %s814_s0 = inlined_call_operand.vmem [shape: f32[80,180], index: 0, kind: input, shape index: {}]   ;;  %s815_s2 = inlined_call_operand.vmem [shape: f32[80,256], index: 2, kind: input, shape index: {}]   ;;  %s816_s3 = inlined_call_operand.vmem [shape: f32[80,256], index: 3, kind: output, shape index: {}]  }
   0x1   :  { %v65_v0 = vld [vmem:[%s813_s1 + $0xf8] sm:$0xff]  ;;  %v64_v1 = vld [vmem:[%s813_s1 + $0xf0] sm:$0xff]  ;;  %v63_v2 = vld [vmem:[%s813_s1 + $0xe8] sm:$0xff] }
   0x2   :  { %138 = vmatprep.subr.mxu0 %v65_v0  ;;  %379 = vmatprep.subr.mxu1 %v65_v0  ;;  %v62_v3 = vld [vmem:[%s813_s1 + $0xe0] sm:$0xff]  ;;  %v61_v4 = vld [vmem:[%s813_s1 + $0xd8] sm:$0xff]  ;;  %v60_v5 = vld [vmem:[%s813_s1 + $0xd0] sm:$0xff] }
   0x3   :  { %139 = vmatpush1.msra.mxu0 %v64_v1  ;;  %402 = vmatpush1.msra.mxu1 %v64_v1  ;;  %v59_v6 = vld [vmem:[%s813_s1 + $0xc8] sm:$0xff]  ;;  %v58_v7 = vld [vmem:[%s813_s1 + $0xc0] sm:$0xff]  ;;  %v57_v8 = vld [vmem:[%s813_s1 + $0xb8] sm:$0xff] }
   0x4   :  { %140 = vmatprep.subr.mxu0 %v63_v2  ;;  %380 = vmatprep.subr.mxu1 %v63_v2  ;;  %v56_v9 = vld [vmem:[%s813_s1 + $0xb0] sm:$0xff]  ;;  %v55_v10 = vld [vmem:[%s813_s1 + $0xa8] sm:$0xff]  ;;  %v54_v11 = vld [vmem:[%s813_s1 + $0xa0] sm:$0xff] }
   0x5   :  { %141 = vmatpush1.msra.mxu0 %v62_v3  ;;  %403 = vmatpush1.msra.mxu1 %v62_v3  ;;  %v53_v12 = vld [vmem:[%s813_s1 + $0x98] sm:$0xff]  ;;  %v52_v13 = vld [vmem:[%s813_s1 + $0x90] sm:$0xff]  ;;  %v51_v14 = vld [vmem:[%s813_s1 + $0x88] sm:$0xff] }
   0x6   :  { %142 = vmatprep.subr.mxu0 %v61_v4  ;;  %381 = vmatprep.subr.mxu1 %v61_v4  ;;  %v50_v15 = vld [vmem:[%s813_s1 + $0x80] sm:$0xff]  ;;  %v49_v16 = vld [vmem:[%s813_s1 + $0x78] sm:$0xff]  ;;  %v48_v17 = vld [vmem:[%s813_s1 + $0x70] sm:$0xff] }
   0x7   :  { %143 = vmatpush1.msra.mxu0 %v60_v5  ;;  %404 = vmatpush1.msra.mxu1 %v60_v5  ;;  %v47_v18 = vld [vmem:[%s813_s1 + $0x68] sm:$0xff]  ;;  %v46_v19 = vld [vmem:[%s813_s1 + $0x60] sm:$0xff]  ;;  %v45_v20 = vld [vmem:[%s813_s1 + $0x58] sm:$0xff] }
   0x8   :  { %144 = vmatprep.subr.mxu0 %v59_v6  ;;  %382 = vmatprep.subr.mxu1 %v59_v6  ;;  %v44_v21 = vld [vmem:[%s813_s1 + $0x50] sm:$0xff]  ;;  %v43_v22 = vld [vmem:[%s813_s1 + $0x48] sm:$0xff]  ;;  %v42_v23 = vld [vmem:[%s813_s1 + $0x40] sm:$0xff] }
   0x9   :  { %145 = vmatpush1.msra.mxu0 %v58_v7  ;;  %405 = vmatpush1.msra.mxu1 %v58_v7  ;;  %v41_v24 = vld [vmem:[%s813_s1 + $0x38] sm:$0xff]  ;;  %v40_v25 = vld [vmem:[%s813_s1 + $0x30] sm:$0xff]  ;;  %v39_v26 = vld [vmem:[%s813_s1 + $0x28] sm:$0xff] }
   0xa   :  { %146 = vmatprep.subr.mxu0 %v57_v8  ;;  %383 = vmatprep.subr.mxu1 %v57_v8  ;;  %v38_v27 = vld [vmem:[%s813_s1 + $0x20] sm:$0xff]  ;;  %v37_v28 = vld [vmem:[%s813_s1 + $0x18] sm:$0xff]  ;;  %v36_v29 = vld [vmem:[%s813_s1 + $0x10] sm:$0xff] }
   0xb   :  { %147 = vmatpush1.msra.mxu0 %v56_v9  ;;  %406 = vmatpush1.msra.mxu1 %v56_v9  ;;  %v35_v30 = vld [vmem:[%s813_s1 + $0x8] sm:$0xff]  ;;  %v34_v31 = vld [vmem:[%s813_s1] sm:$0xff]  ;;  %v77_v34 = vld [vmem:[%s813_s1 + $0x158] sm:$0xff] }
   0xc   :  { %148 = vmatprep.subr.mxu0 %v55_v10  ;;  %384 = vmatprep.subr.mxu1 %v55_v10  ;;  %v79_v32 = vld [vmem:[%s813_s1 + $0x168] sm:$0xf]  ;;  %v78_v33 = vld [vmem:[%s813_s1 + $0x160] sm:$0xf]  ;;  %v76_v35 = vld [vmem:[%s813_s1 + $0x150] sm:$0xff] }
   0xd   :  { %149 = vmatpush1.msra.mxu0 %v54_v11  ;;  %407 = vmatpush1.msra.mxu1 %v54_v11  ;;  %v75_v36 = vld [vmem:[%s813_s1 + $0x148] sm:$0xff]  ;;  %v74_v37 = vld [vmem:[%s813_s1 + $0x140] sm:$0xff]  ;;  %v73_v38 = vld [vmem:[%s813_s1 + $0x138] sm:$0xff] }
   0xe   :  { %150 = vmatprep.subr.mxu0 %v53_v12  ;;  %385 = vmatprep.subr.mxu1 %v53_v12  ;;  %v72_v39 = vld [vmem:[%s813_s1 + $0x130] sm:$0xff]  ;;  %v71_v40 = vld [vmem:[%s813_s1 + $0x128] sm:$0xff]  ;;  %v70_v41 = vld [vmem:[%s813_s1 + $0x120] sm:$0xff] }
   0xf   :  { %151 = vmatpush1.msra.mxu0 %v52_v13  ;;  %408 = vmatpush1.msra.mxu1 %v52_v13  ;;  %v69_v42 = vld [vmem:[%s813_s1 + $0x118] sm:$0xff]  ;;  %v68_v43 = vld [vmem:[%s813_s1 + $0x110] sm:$0xff]  ;;  %v67_v44 = vld [vmem:[%s813_s1 + $0x108] sm:$0xff] }
  0x10   :  { %152 = vmatprep.subr.mxu0 %v51_v14  ;;  %386 = vmatprep.subr.mxu1 %v51_v14  ;;  %v66_v45 = vld [vmem:[%s813_s1 + $0x100] sm:$0xff]  ;;  %v15_v46 = vld [vmem:[%s814_s0 + $0x8] sm:$0xff]  ;;  %v25_v47 = vld [vmem:[%s814_s0 + $0x58] sm:$0xff] }
  0x11   :  { %153 = vmatpush1.msra.mxu0 %v50_v15  ;;  %409 = vmatpush1.msra.mxu1 %v50_v15  ;;  %v14_v48 = vld [vmem:[%s814_s0] sm:$0xff]  ;;  %v24_v49 = vld [vmem:[%s814_s0 + $0x50] sm:$0xff]  ;;  %v17_v50 = vld [vmem:[%s814_s0 + $0x18] sm:$0xff] }
  0x12   :  { %154 = vmatprep.subr.mxu0 %v49_v16  ;;  %387 = vmatprep.subr.mxu1 %v49_v16  ;;  %v27_v51 = vld [vmem:[%s814_s0 + $0x68] sm:$0xff]  ;;  %v16_v52 = vld [vmem:[%s814_s0 + $0x10] sm:$0xff]  ;;  %v26_v53 = vld [vmem:[%s814_s0 + $0x60] sm:$0xff] }
  0x13   :  { %155 = vmatpush1.msra.mxu0 %v48_v17  ;;  %410 = vmatpush1.msra.mxu1 %v48_v17  ;;  %v19_v54 = vld [vmem:[%s814_s0 + $0x28] sm:$0xff]  ;;  %v29_v55 = vld [vmem:[%s814_s0 + $0x78] sm:$0xff]  ;;  %v18_v56 = vld [vmem:[%s814_s0 + $0x20] sm:$0xff] }
  0x14   :  { %156 = vmatprep.subr.mxu0 %v47_v18  ;;  %388 = vmatprep.subr.mxu1 %v47_v18  ;;  %v28_v57 = vld [vmem:[%s814_s0 + $0x70] sm:$0xff]  ;;  %v21_v58 = vld [vmem:[%s814_s0 + $0x38] sm:$0xff]  ;;  %v31_v59 = vld [vmem:[%s814_s0 + $0x88] sm:$0xff] }
  0x15   :  { %157 = vmatpush1.msra.mxu0 %v46_v19  ;;  %411 = vmatpush1.msra.mxu1 %v46_v19  ;;  %v20_v60 = vld [vmem:[%s814_s0 + $0x30] sm:$0xff]  ;;  %v30_v61 = vld [vmem:[%s814_s0 + $0x80] sm:$0xff]  ;;  %v23_v62 = vld [vmem:[%s814_s0 + $0x48] sm:$0xff] }
  0x16   :  { %158 = vmatprep.subr.mxu0 %v45_v20  ;;  %389 = vmatprep.subr.mxu1 %v45_v20  ;;  %v33_v63 = vld [vmem:[%s814_s0 + $0x98] sm:$0xff]  ;;  %v22_v0 = vld [vmem:[%s814_s0 + $0x40] sm:$0xff]  ;;  %v32_v1 = vld [vmem:[%s814_s0 + $0x90] sm:$0xff] }
  0x17   :  { %159 = vmatpush1.msra.mxu0 %v44_v21  ;;  %412 = vmatpush1.msra.mxu1 %v44_v21  ;;  %v80_v2 = vld [vmem:[%s815_s2] sm:$0xff]  ;;  %v90_v3 = vld [vmem:[%s815_s2 + $0x50] sm:$0xff]  ;;  %v81_v6 = vld [vmem:[%s815_s2 + $0x8] sm:$0xff] }
  0x18   :  { %160 = vmatprep.subr.mxu0 %v43_v22  ;;  %390 = vmatprep.subr.mxu1 %v43_v22  ;;  %v91_v7 = vld [vmem:[%s815_s2 + $0x58] sm:$0xff]  ;;  %v82_v12 = vld [vmem:[%s815_s2 + $0x10] sm:$0xff]  ;;  %v92_v17 = vld [vmem:[%s815_s2 + $0x60] sm:$0xff] }
  0x19   :  { %161 = vmatpush1.msra.mxu0 %v42_v23  ;;  %413 = vmatpush1.msra.mxu1 %v42_v23  ;;  %v83_v20 = vld [vmem:[%s815_s2 + $0x18] sm:$0xff]  ;;  %v93_v21 = vld [vmem:[%s815_s2 + $0x68] sm:$0xff] }
  0x1a   :  { %162 = vmatprep.subr.mxu0 %v41_v24  ;;  %391 = vmatprep.subr.mxu1 %v41_v24 }
  0x1b   :  { %163 = vmatpush1.msra.mxu0 %v40_v25  ;;  %414 = vmatpush1.msra.mxu1 %v40_v25 }
  0x1c   :  { %164 = vmatprep.subr.mxu0 %v39_v26  ;;  %392 = vmatprep.subr.mxu1 %v39_v26 }
  0x1d   :  { %165 = vmatpush1.msra.mxu0 %v38_v27  ;;  %415 = vmatpush1.msra.mxu1 %v38_v27 }
  0x1e   :  { %166 = vmatprep.subr.mxu0 %v37_v28  ;;  %393 = vmatprep.subr.mxu1 %v37_v28  ;;  %v84_v28 = vld [vmem:[%s815_s2 + $0x20] sm:$0xff] }
  0x1f   :  { %167 = vmatpush1.msra.mxu0 %v36_v29  ;;  %416 = vmatpush1.msra.mxu1 %v36_v29 }
  0x20   :  { %168 = vmatprep.subr.mxu0 %v35_v30  ;;  %394 = vmatprep.subr.mxu1 %v35_v30 }
  0x21   :  { %169 = vmatpush1.msra.mxu0 %v34_v31  ;;  %417 = vmatpush1.msra.mxu1 %v34_v31 }
  0x22   :  { %367 = vmatprep.subr.msk.mxu0 %vm131_vm0, %v79_v32  ;;  %395 = vmatprep.subr.msk.mxu1 %vm131_vm0, %v79_v32  ;;  %v94_v32 = vld [vmem:[%s815_s2 + $0x70] sm:$0xff] }
  0x23   :  { %368 = vmatpush2.msk.msra.mxu0 %vm131_vm0, %v78_v33  ;;  %418 = vmatpush2.msk.msra.mxu1 %vm131_vm0, %v78_v33 }
  0x24   :  { %190 = vmatprep.subr.mxu0 %v77_v34  ;;  %396 = vmatprep.subr.mxu1 %v77_v34 }
  0x25   :  { %191 = vmatpush2.msra.mxu0 %v76_v35  ;;  %419 = vmatpush2.msra.mxu1 %v76_v35 }
  0x26   :  { %192 = vmatprep.subr.mxu0 %v75_v36  ;;  %397 = vmatprep.subr.mxu1 %v75_v36  ;;  %v85_v36 = vld [vmem:[%s815_s2 + $0x28] sm:$0xff] }
  0x27   :  { %193 = vmatpush2.msra.mxu0 %v74_v37  ;;  %420 = vmatpush2.msra.mxu1 %v74_v37  ;;  %v95_v37 = vld [vmem:[%s815_s2 + $0x78] sm:$0xff] }
  0x28   :  { %194 = vmatprep.subr.mxu0 %v73_v38  ;;  %398 = vmatprep.subr.mxu1 %v73_v38 }
  0x29   :  { %195 = vmatpush2.msra.mxu0 %v72_v39  ;;  %421 = vmatpush2.msra.mxu1 %v72_v39 }
  0x2a   :  { %196 = vmatprep.subr.mxu0 %v71_v40  ;;  %399 = vmatprep.subr.mxu1 %v71_v40 }
  0x2b   :  { %197 = vmatpush2.msra.mxu0 %v70_v41  ;;  %422 = vmatpush2.msra.mxu1 %v70_v41 }
  0x2c   :  { %198 = vmatprep.subr.mxu0 %v69_v42  ;;  %400 = vmatprep.subr.mxu1 %v69_v42 }
  0x2d   :  { %199 = vmatpush2.msra.mxu0 %v68_v43  ;;  %423 = vmatpush2.msra.mxu1 %v68_v43 }
  0x2e   :  { %200 = vmatprep.subr.mxu0 %v67_v44  ;;  %401 = vmatprep.subr.mxu1 %v67_v44  ;;  %v86_v44 = vld [vmem:[%s815_s2 + $0x30] sm:$0xff] }
  0x2f   :  { %201 = vmatpush2.msra.mxu0 %v66_v45  ;;  %424 = vmatpush2.msra.mxu1 %v66_v45 }
  0x30   :  { %369 = vmatprep.mubr.msk.f32.mxu0 %vm100_vm1, %v15_v46  ;;  %374 = vmatprep.mubr.msk.f32.mxu1 %vm100_vm1, %v25_v47 }
  0x31   :  { %203 = vmatmul.mubr.f32.vlgmr.msra.gmra.mxu0 %v14_v48  ;;  %233 = vmatmul.mubr.f32.vlgmr.msra.gmra.mxu1 %v24_v49  ;;  %v96_v48 = vld [vmem:[%s815_s2 + $0x80] sm:$0xff] }
  0x32   :  { %370 = vmatprep.mubr.msk.f32.mxu0 %vm100_vm1, %v17_v50  ;;  %375 = vmatprep.mubr.msk.f32.mxu1 %vm100_vm1, %v27_v51 }
  0x35   :  { %209 = vmatmul.mubr.f32.gmra.mxu0 %v16_v52  ;;  %239 = vmatmul.mubr.f32.gmra.mxu1 %v26_v53  ;;  %v87_v52 = vld [vmem:[%s815_s2 + $0x38] sm:$0xff]  ;;  %v97_v53 = vld [vmem:[%s815_s2 + $0x88] sm:$0xff] }
  0x36   :  { %371 = vmatprep.mubr.msk.f32.mxu0 %vm100_vm1, %v19_v54  ;;  %376 = vmatprep.mubr.msk.f32.mxu1 %vm100_vm1, %v29_v55 }
  0x39   :  { %215 = vmatmul.mubr.f32.gmra.mxu0 %v18_v56  ;;  %245 = vmatmul.mubr.f32.gmra.mxu1 %v28_v57 }
  0x3a   :  { %372 = vmatprep.mubr.msk.f32.mxu0 %vm100_vm1, %v21_v58  ;;  %377 = vmatprep.mubr.msk.f32.mxu1 %vm100_vm1, %v31_v59 }
  0x3d   :  { %221 = vmatmul.mubr.f32.gmra.mxu0 %v20_v60  ;;  %251 = vmatmul.mubr.f32.gmra.mxu1 %v30_v61  ;;  %v88_v60 = vld [vmem:[%s815_s2 + $0x40] sm:$0xff] }
  0x3e   :  { %373 = vmatprep.mubr.msk.f32.mxu0 %vm100_vm1, %v23_v62  ;;  %378 = vmatprep.mubr.msk.f32.mxu1 %vm100_vm1, %v33_v63 }
  0x41   :  { %227 = vmatmul.mubr.f32.gmra.mxu0 %v22_v0  ;;  %257 = vmatmul.mubr.f32.gmra.mxu1 %v32_v1  ;;  %v98_v0 = vld [vmem:[%s815_s2 + $0x90] sm:$0xff] }
  0xf1   :  { %v204_v4 = vpop.f32.mrf.mxu0  ;;  %v234_v5 = vpop.f32.mrf.mxu1 }
  0xf2   :  { %v205_v8 = vadd.f32 %v204_v4, %v80_v2  ;;  %v235_v9 = vadd.f32 %v234_v5, %v90_v3  ;;  %v89_v4 = vld [vmem:[%s815_s2 + $0x48] sm:$0xff] }
  0xf3   :  { %v206_v10 = vpop.f32.mrf.mxu0  ;;  %v236_v11 = vpop.f32.mrf.mxu1 }
  0xf4   :  { %v263_v13 = vmul.f32 0.5, %v205_v8  ;;  %v273_v14 = vmul.f32 0.5, %v235_v9  ;;  %v207_v15 = vadd.f32 %v206_v10, %v81_v6  ;;  %v237_v16 = vadd.f32 %v236_v11, %v91_v7  ;;  %v99_v8 = vld [vmem:[%s815_s2 + $0x98] sm:$0xff] }
  0xf5   :  { %v210_v18 = vpop.f32.mrf.mxu0  ;;  %v240_v19 = vpop.f32.mrf.mxu1 }
  0xf6   :  { %425 = vtanh.f32 %v263_v13  ;;  %v264_v22 = vmul.f32 0.5, %v207_v15  ;;  %v274_v23 = vmul.f32 0.5, %v237_v16  ;;  %v211_v24 = vadd.f32 %v210_v18, %v82_v12 }
  0xf7   :  { %427 = vtanh.f32 %v273_v14  ;;  %v241_v25 = vadd.f32 %v240_v19, %v92_v17  ;;  %v212_v26 = vpop.f32.mrf.mxu0  ;;  %v242_v27 = vpop.f32.mrf.mxu1 }
  0xf8   :  { %429 = vtanh.f32 %v264_v22  ;;  %v265_v29 = vmul.f32 0.5, %v211_v24  ;;  %v213_v30 = vadd.f32 %v212_v26, %v83_v20  ;;  %v243_v31 = vadd.f32 %v242_v27, %v93_v21 }
  0xf9   :  { %431 = vtanh.f32 %v274_v23  ;;  %v275_v33 = vmul.f32 0.5, %v241_v25  ;;  %v216_v34 = vpop.f32.mrf.mxu0  ;;  %v246_v35 = vpop.f32.mrf.mxu1 }
  0xfa   :  { %433 = vtanh.f32 %v265_v29  ;;  %v266_v38 = vmul.f32 0.5, %v213_v30  ;;  %v276_v39 = vmul.f32 0.5, %v243_v31  ;;  %v217_v40 = vadd.f32 %v216_v34, %v84_v28 }
  0xfb   :  { %435 = vtanh.f32 %v275_v33  ;;  %v247_v41 = vadd.f32 %v246_v35, %v94_v32  ;;  %v218_v42 = vpop.f32.mrf.mxu0  ;;  %v248_v43 = vpop.f32.mrf.mxu1 }
  0xfc   :  { %437 = vtanh.f32 %v266_v38  ;;  %v267_v45 = vmul.f32 0.5, %v217_v40  ;;  %v219_v46 = vadd.f32 %v218_v42, %v85_v36  ;;  %v249_v47 = vadd.f32 %v248_v43, %v95_v37 }
  0xfd   :  { %439 = vtanh.f32 %v276_v39  ;;  %v277_v49 = vmul.f32 0.5, %v247_v41  ;;  %v222_v50 = vpop.f32.mrf.mxu0  ;;  %v252_v51 = vpop.f32.mrf.mxu1 }
  0xfe   :  { %441 = vtanh.f32 %v267_v45  ;;  %v268_v54 = vmul.f32 0.5, %v219_v46  ;;  %v278_v55 = vmul.f32 0.5, %v249_v47  ;;  %v223_v56 = vadd.f32 %v222_v50, %v86_v44 }
  0xff   :  { %443 = vtanh.f32 %v277_v49  ;;  %v253_v57 = vadd.f32 %v252_v51, %v96_v48  ;;  %v224_v58 = vpop.f32.mrf.mxu0  ;;  %v254_v59 = vpop.f32.mrf.mxu1 }
 0x100   :  { %445 = vtanh.f32 %v268_v54  ;;  %v269_v61 = vmul.f32 0.5, %v223_v56  ;;  %v225_v62 = vadd.f32 %v224_v58, %v87_v52  ;;  %v255_v63 = vadd.f32 %v254_v59, %v97_v53 }
 0x101   :  { %447 = vtanh.f32 %v278_v55  ;;  %v279_v1 = vmul.f32 0.5, %v253_v57  ;;  %v228_v2 = vpop.f32.mrf.mxu0  ;;  %v258_v3 = vpop.f32.mrf.mxu1 }
 0x102   :  { %449 = vtanh.f32 %v269_v61  ;;  %v270_v5 = vmul.f32 0.5, %v225_v62  ;;  %v280_v6 = vmul.f32 0.5, %v255_v63  ;;  %v229_v7 = vadd.f32 %v228_v2, %v88_v60 }
 0x103   :  { %v426_v9 = vpop.eup %425  ;;  %451 = vtanh.f32 %v279_v1  ;;  %v259_v10 = vadd.f32 %v258_v3, %v98_v0  ;;  %v230_v11 = vpop.f32.mrf.mxu0 }
 0x104   :  { %v260_v12 = vpop.f32.mrf.mxu1  ;;  %v428_v13 = vpop.eup %427  ;;  %v303_v14 = vmul.f32 0.5, %v426_v9  ;;  %453 = vtanh.f32 %v270_v5  ;;  %v271_v15 = vmul.f32 0.5, %v229_v7  ;;  %v231_v16 = vadd.f32 %v230_v11, %v89_v4 }
 0x105   :  { %v430_v17 = vpop.eup %429  ;;  %v313_v18 = vmul.f32 0.5, %v428_v13  ;;  %455 = vtanh.f32 %v280_v6  ;;  %v281_v19 = vmul.f32 0.5, %v259_v10  ;;  %v261_v20 = vadd.f32 %v260_v12, %v99_v8 }
 0x106   :  { %v432_v21 = vpop.eup %431  ;;  %v323_v22 = vadd.f32 0.5, %v303_v14  ;;  %v304_v23 = vmul.f32 0.5, %v430_v17  ;;  %457 = vtanh.f32 %v271_v15  ;;  %v272_v24 = vmul.f32 0.5, %v231_v16 }
 0x107   :  { %v434_v25 = vpop.eup %433  ;;  %v333_v26 = vadd.f32 0.5, %v313_v18  ;;  %v314_v27 = vmul.f32 0.5, %v432_v21  ;;  %459 = vtanh.f32 %v281_v19  ;;  %v282_v28 = vmul.f32 0.5, %v261_v20 }
 0x108   :  { %v436_v29 = vpop.eup %435  ;;  %343 = vst [vmem:[%s816_s3] sm:$0xff] %v323_v22  ;;  %v324_v30 = vadd.f32 0.5, %v304_v23  ;;  %v305_v31 = vmul.f32 0.5, %v434_v25  ;;  %461 = vtanh.f32 %v272_v24 }
 0x109   :  { %v438_v32 = vpop.eup %437  ;;  %353 = vst [vmem:[%s816_s3 + $0x50] sm:$0xff] %v333_v26  ;;  %v334_v33 = vadd.f32 0.5, %v314_v27  ;;  %v315_v34 = vmul.f32 0.5, %v436_v29  ;;  %463 = vtanh.f32 %v282_v28 }
 0x10a   :  { %v440_v35 = vpop.eup %439  ;;  %344 = vst [vmem:[%s816_s3 + $0x8] sm:$0xff] %v324_v30  ;;  %v325_v36 = vadd.f32 0.5, %v305_v31  ;;  %v306_v37 = vmul.f32 0.5, %v438_v32 }
 0x10b   :  { %v442_v38 = vpop.eup %441  ;;  %354 = vst [vmem:[%s816_s3 + $0x58] sm:$0xff] %v334_v33  ;;  %v335_v39 = vadd.f32 0.5, %v315_v34  ;;  %v316_v40 = vmul.f32 0.5, %v440_v35 }
 0x10c   :  { %v444_v41 = vpop.eup %443  ;;  %345 = vst [vmem:[%s816_s3 + $0x10] sm:$0xff] %v325_v36  ;;  %v326_v42 = vadd.f32 0.5, %v306_v37  ;;  %v307_v43 = vmul.f32 0.5, %v442_v38 }
 0x10d   :  { %v446_v44 = vpop.eup %445  ;;  %355 = vst [vmem:[%s816_s3 + $0x60] sm:$0xff] %v335_v39  ;;  %v336_v45 = vadd.f32 0.5, %v316_v40  ;;  %v317_v46 = vmul.f32 0.5, %v444_v41 }
 0x10e   :  { %v448_v47 = vpop.eup %447  ;;  %346 = vst [vmem:[%s816_s3 + $0x18] sm:$0xff] %v326_v42  ;;  %v327_v48 = vadd.f32 0.5, %v307_v43  ;;  %v308_v49 = vmul.f32 0.5, %v446_v44 }
 0x10f   :  { %v450_v50 = vpop.eup %449  ;;  %356 = vst [vmem:[%s816_s3 + $0x68] sm:$0xff] %v336_v45  ;;  %v337_v51 = vadd.f32 0.5, %v317_v46  ;;  %v318_v52 = vmul.f32 0.5, %v448_v47 }
 0x110   :  { %v452_v53 = vpop.eup %451  ;;  %347 = vst [vmem:[%s816_s3 + $0x20] sm:$0xff] %v327_v48  ;;  %v328_v54 = vadd.f32 0.5, %v308_v49  ;;  %v309_v55 = vmul.f32 0.5, %v450_v50 }
 0x111   :  { %v454_v56 = vpop.eup %453  ;;  %357 = vst [vmem:[%s816_s3 + $0x70] sm:$0xff] %v337_v51  ;;  %v338_v57 = vadd.f32 0.5, %v318_v52  ;;  %v319_v58 = vmul.f32 0.5, %v452_v53 }
 0x112   :  { %v456_v59 = vpop.eup %455  ;;  %348 = vst [vmem:[%s816_s3 + $0x28] sm:$0xff] %v328_v54  ;;  %v329_v60 = vadd.f32 0.5, %v309_v55  ;;  %v310_v61 = vmul.f32 0.5, %v454_v56 }
 0x113   :  { %v458_v62 = vpop.eup %457  ;;  %358 = vst [vmem:[%s816_s3 + $0x78] sm:$0xff] %v338_v57  ;;  %v339_v63 = vadd.f32 0.5, %v319_v58  ;;  %v320_v0 = vmul.f32 0.5, %v456_v59 }
 0x114   :  { %v460_v1 = vpop.eup %459  ;;  %349 = vst [vmem:[%s816_s3 + $0x30] sm:$0xff] %v329_v60  ;;  %v330_v2 = vadd.f32 0.5, %v310_v61  ;;  %v311_v3 = vmul.f32 0.5, %v458_v62 }
 0x115   :  { %v462_v4 = vpop.eup %461  ;;  %359 = vst [vmem:[%s816_s3 + $0x80] sm:$0xff] %v339_v63  ;;  %v340_v5 = vadd.f32 0.5, %v320_v0  ;;  %v321_v6 = vmul.f32 0.5, %v460_v1 }
 0x116   :  { %v464_v7 = vpop.eup %463  ;;  %350 = vst [vmem:[%s816_s3 + $0x38] sm:$0xff] %v330_v2  ;;  %v331_v8 = vadd.f32 0.5, %v311_v3  ;;  %v312_v9 = vmul.f32 0.5, %v462_v4 }
 0x117   :  { %360 = vst [vmem:[%s816_s3 + $0x88] sm:$0xff] %v340_v5  ;;  %v341_v10 = vadd.f32 0.5, %v321_v6  ;;  %v322_v11 = vmul.f32 0.5, %v464_v7 }
 0x118   :  { %351 = vst [vmem:[%s816_s3 + $0x40] sm:$0xff] %v331_v8  ;;  %v332_v12 = vadd.f32 0.5, %v312_v9 }
 0x119   :  { %361 = vst [vmem:[%s816_s3 + $0x90] sm:$0xff] %v341_v10  ;;  %v342_v13 = vadd.f32 0.5, %v322_v11 }
 0x11a   :  { %352 = vst [vmem:[%s816_s3 + $0x48] sm:$0xff] %v332_v12 }
 0x11b   :  { %362 = vst [vmem:[%s816_s3 + $0x98] sm:$0xff] %v342_v13 }

</bundles_post_ra>
